<compile_context>
chip_gen: v7x
topology: tpu7x:2x2x1
jax: 0.10.0
libtpu: 0.0.40
codegen_flags: <defaults>
</compile_context>

<pallas_src>
import jax
import jax.numpy as jnp
from jax.experimental import pallas as pl
from jax.experimental.pallas import tpu as pltpu


# ------------------------------- helpers -------------------------------------
def _round_up(v, m):
    return ((v + m - 1) // m) * m


def _divisors_128_desc(padded):
    """All 128-multiple divisors of `padded` (itself a 128-multiple), descending."""
    return [t for t in range(padded, 0, -128) if padded % t == 0]


def _select_tiles(Mp, Kp, Np, in_bytes, budget_bytes):
    """Largest (tk, tn) 128-multiple divisors of Kp/Np fitting the VMEM budget.

    Preference order: collapse K first (tk == Kp removes the reduction axis,
    the accumulator scratch and all per-K grid-step overhead), then the
    largest tn.  Budget counts double-buffered input tiles + f32 output tile.
    """
    def fits(tk, tn):
        tile_bytes = 2 * (Mp * tk + tk * tn + tn) * in_bytes + 2 * Mp * tn * 4
        return tile_bytes <= budget_bytes

    for tk in _divisors_128_desc(Kp):
        for tn in _divisors_128_desc(Np):
            if fits(tk, tn):
                return tk, tn
    return 128, 128  # last resort; always fits for any sane budget


# ----------------------------- Pallas kernels ----------------------------------
def _fused_linear_single_k_kernel(x_ref, w_ref, b_ref, o_ref):
    # Branch axis squeezed away.  Whole K in one block:
    #   x_ref: (tm, Kp)  w_ref: (Kp, tn)  b_ref: (1, tn)  o_ref: (tm, tn) f32
    o_ref[...] = (
        jnp.dot(x_ref[...], w_ref[...], preferred_element_type=jnp.float32)
        + b_ref[...]
    )


def _fused_linear_multi_k_kernel(x_ref, w_ref, b_ref, o_ref, acc_ref):
    # Fallback path when K does not fit VMEM in one block.
    #   x_ref: (tm, tk)  w_ref: (tk, tn)  b_ref: (1, tn)
    #   o_ref: (tm, tn) f32   acc_ref: (tm, tn) f32 scratch
    k = pl.program_id(3)

    @pl.when(k == 0)
    def _():
        acc_ref[...] = jnp.zeros_like(acc_ref)

    acc_ref[...] += jnp.dot(x_ref[...], w_ref[...],
                            preferred_element_type=jnp.float32)

    @pl.when(k == pl.num_programs(3) - 1)
    def _():
        o_ref[...] = acc_ref[...] + b_ref[...]


def fused_linear_pallas(x_stacked, w_stacked, b_stacked, *, tm, tn, tk):
    """out[g] = x[g] @ w[g] + b[g] for both branches g in one pallas_call.

    x_stacked: (G, Mp, Kp)  activations (bf16/f32), padded
    w_stacked: (G, Kp, Np)  weights, transposed + padded at init
    b_stacked: (G, 1,  Np)  biases, f32
    Returns (G, Mp, Np) in f32 (written from the f32 MXU accumulator).
    """
    G, Mp, Kp = x_stacked.shape
    _, _, Np = w_stacked.shape
    assert Mp % tm == 0 and Np % tn == 0 and Kp % tk == 0

    cost = pl.CostEstimate(
        flops=2 * G * Mp * Kp * Np,
        transcendentals=0,
        bytes_accessed=(x_stacked.size * x_stacked.dtype.itemsize
                        + w_stacked.size * w_stacked.dtype.itemsize
                        + b_stacked.size * b_stacked.dtype.itemsize
                        + G * Mp * Np * 4),
    )
    out_shape = jax.ShapeDtypeStruct((G, Mp, Np), jnp.float32)

    if tk == Kp:
        # Fast path: one grid step per (branch, M tile, N tile); no reduction
        # axis, no scratch, no pl.when phases.
        return pl.pallas_call(
            _fused_linear_single_k_kernel,
            out_shape=out_shape,
            grid=(G, Mp // tm, Np // tn),
            in_specs=[
                pl.BlockSpec((None, tm, Kp), lambda g, i, j: (g, i, 0)),
                pl.BlockSpec((None, Kp, tn), lambda g, i, j: (g, 0, j)),
                pl.BlockSpec((None, 1, tn), lambda g, i, j: (g, 0, j)),
            ],
            out_specs=pl.BlockSpec((None, tm, tn), lambda g, i, j: (g, i, j)),
            compiler_params=pltpu.CompilerParams(
                dimension_semantics=("parallel", "parallel", "parallel")),
            cost_estimate=cost,
        )(x_stacked, w_stacked, b_stacked)

    # Fallback: K too large for a single VMEM block -> classic accumulator path.
    return pl.pallas_call(
        _fused_linear_multi_k_kernel,
        out_shape=out_shape,
        grid=(G, Mp // tm, Np // tn, Kp // tk),
        in_specs=[
            pl.BlockSpec((None, tm, tk), lambda g, i, j, k: (g, i, k)),
            pl.BlockSpec((None, tk, tn), lambda g, i, j, k: (g, k, j)),
            pl.BlockSpec((None, 1, tn), lambda g, i, j, k: (g, 0, j)),
        ],
        out_specs=pl.BlockSpec((None, tm, tn), lambda g, i, j, k: (g, i, j)),
        scratch_shapes=[pltpu.VMEM((tm, tn), jnp.float32)],
        compiler_params=pltpu.CompilerParams(
            dimension_semantics=("parallel", "parallel", "parallel", "arbitrary")),
        cost_estimate=cost,
    )(x_stacked, w_stacked, b_stacked)


# --------------------------- Parameter creation --------------------------------
def _kaiming_normal_fan_out(key, out_features, in_features, dtype=jnp.float32):
    # nn.init.kaiming_normal_(w, a=0, mode='fan_out'): std = sqrt(2 / fan_out)
    std = jnp.asarray((2.0 / out_features) ** 0.5, dtype)
    w = jax.random.normal(key, (out_features, in_features), dtype) * std
    b = jnp.zeros((out_features,), dtype)
    return w, b


def init_hungrian_head_params(key, visual_size, textual_size, embed_size):
    k1, k2, k3, k4 = jax.random.split(key, 4)
    return {
        # (out_features, in_features) layout, matching PyTorch nn.Linear.
        "visual_embed_layer": _kaiming_normal_fan_out(k1, embed_size, visual_size),
        "textual_embed_layer": _kaiming_normal_fan_out(k2, embed_size, textual_size),
        # Training-only layers (kept for parity with the module, unused at eval).
        "patch_embed_layer": _kaiming_normal_fan_out(k3, embed_size, visual_size),
        "att_embed_layer": _kaiming_normal_fan_out(k4, embed_size, textual_size),
    }


def pack_eval_params(params, compute_dtype=jnp.bfloat16):
    """One-time repack of the eval-path weights into kernel layout.

    Transposes nn.Linear (N, K) -> (K, N), pads K/N to 128-multiples, stacks
    the {visual, textual} branches.  Weights default to bf16 (native MXU path
    on v5e/v6e/v7x, half the HBM traffic); biases stay f32 and are added to
    the f32 accumulator inside the kernel.
    """
    # TODO(synk): if visual_size and textual_size differ a lot, padding both
    # branches to Kp = max(Kv, Kt) wastes weight DMA / MXU work on the smaller
    # branch; a per-branch K extent (scalar-prefetch index_map) would fix it.
    wv, bv = params["visual_embed_layer"]     # (E, Kv), (E,)
    wt, bt = params["textual_embed_layer"]    # (E, Kt), (E,)
    E = wv.shape[0]
    Kv, Kt = wv.shape[1], wt.shape[1]

    Kp = _round_up(max(Kv, Kt), 128)
    Np = _round_up(E, 128)

    w_stacked = jnp.zeros((2, Kp, Np), compute_dtype)
    w_stacked = w_stacked.at[0, :Kv, :E].set(wv.T.astype(compute_dtype))
    w_stacked = w_stacked.at[1, :Kt, :E].set(wt.T.astype(compute_dtype))

    b_stacked = jnp.zeros((2, 1, Np), jnp.float32)
    b_stacked = b_stacked.at[0, 0, :E].set(bv.astype(jnp.float32))
    b_stacked = b_stacked.at[1, 0, :E].set(bt.astype(jnp.float32))

    return w_stacked, b_stacked


# ------------------------------ Forward pass -----------------------------------
def make_hungrian_head_forward(visual_size, textual_size, embed_size,
                               *, compute_dtype=jnp.bfloat16,
                               vmem_budget_bytes=24 * 1024 * 1024):
    """Build the jitted eval forward closed over the static sizing config."""
    Kp = _round_up(max(visual_size, textual_size), 128)
    Np = _round_up(embed_size, 128)
    in_bytes = jnp.dtype(compute_dtype).itemsize
    m_align = 16 if in_bytes < 4 else 8   # bf16 sublane packing vs f32

    @jax.jit
    def forward(w_stacked, b_stacked, visual_feature, textual_feature):
        """visual_feature: (B, 1+P, visual_size); textual_feature: (B, textual_size)."""
        B = visual_feature.shape[0]
        Mp = _round_up(B, m_align)
        tm = Mp                                   # full-M block; no 128 padding
        tk, tn = _select_tiles(Mp, Kp, Np, in_bytes, vmem_budget_bytes)

        # CLS token; patch tokens are only used by the training branch.
        visual_cls = visual_feature[:, 0]         # (B, visual_size)

        # Cheap activation packing: two pads + one stack (no zeros + scatter).
        xv = jnp.pad(visual_cls.astype(compute_dtype),
                     ((0, Mp - B), (0, Kp - visual_size)))
        xt = jnp.pad(textual_feature.astype(compute_dtype),
                     ((0, Mp - B), (0, Kp - textual_size)))
        x_stacked = jnp.stack([xv, xt], axis=0)   # (2, Mp, Kp)

        out = fused_linear_pallas(x_stacked, w_stacked, b_stacked,
                                  tm=tm, tn=tn, tk=tk)   # (2, Mp, Np) f32

        visual_embed = out[0, :B, :embed_size].astype(visual_feature.dtype)
        textual_embed = out[1, :B, :embed_size].astype(textual_feature.dtype)
        return [visual_embed, textual_embed], None

    return forward


# ---------------------------------- Main ----------------------------------------
if __name__ == "__main__":
    B = 2
    num_patches = 8
    visual_size = 32
    textual_size = 32
    embed_size = 32

    key = jax.random.PRNGKey(0)
    k_params, k_vis, k_txt = jax.random.split(key, 3)

    params = init_hungrian_head_params(k_params, visual_size, textual_size, embed_size)
    # One-time weight repack (transpose + pad + stack + bf16 cast), outside the hot path.
    w_stacked, b_stacked = pack_eval_params(params, compute_dtype=jnp.bfloat16)

    forward = make_hungrian_head_forward(visual_size, textual_size, embed_size,
                                         compute_dtype=jnp.bfloat16)

    visual_feature = jax.random.normal(
        k_vis, (B, 1 + num_patches, visual_size), jnp.float32)
    textual_feature = jax.random.normal(
        k_txt, (B, textual_size), jnp.float32)

    outputs, losses = forward(w_stacked, b_stacked, visual_feature, textual_feature)
    outputs = [jax.block_until_ready(o) for o in outputs]

    # Reference with identical numerics (bf16 inputs/weights, f32 accumulation).
    wv, bv = params["visual_embed_layer"]
    wt, bt = params["textual_embed_layer"]
    cd = jnp.bfloat16
    ref_visual = jnp.dot(visual_feature[:, 0].astype(cd), wv.T.astype(cd),
                         preferred_element_type=jnp.float32) + bv
    ref_textual = jnp.dot(textual_feature.astype(cd), wt.T.astype(cd),
                          preferred_element_type=jnp.float32) + bt

    assert outputs[0].shape == (B, embed_size)
    assert outputs[1].shape == (B, embed_size)
    assert jnp.allclose(outputs[0], ref_visual, atol=2e-3, rtol=2e-3)
    assert jnp.allclose(outputs[1], ref_textual, atol=2e-3, rtol=2e-3)
    assert losses is None

    print("KERNEL_OK")
</pallas_src>

<mosaic_0001>
module attributes {stable_mosaic.version = 11 : i64} {
  func.func @_fused_linear_single_k_kernel(%arg0: i32, %arg1: i32, %arg2: i32, %arg3: memref<1x16x128xbf16, #tpu.memory_space<vmem>>, %arg4: memref<1x128x128xbf16, #tpu.memory_space<vmem>>, %arg5: memref<1x1x128xf32, #tpu.memory_space<vmem>>, %arg6: memref<1x16x128xf32, #tpu.memory_space<vmem>>) attributes {dimension_semantics = [#tpu.dimension_semantics<parallel>, #tpu.dimension_semantics<parallel>, #tpu.dimension_semantics<parallel>], iteration_bounds = array<i64: 2, 1, 1>, scalar_prefetch = 0 : i64, scratch_operands = 0 : i64, tpu.core_type = #tpu.core_type<tc>, window_params = [{transform_indices = @transform_0, window_bounds = array<i64: 1, 16, 128>}, {transform_indices = @transform_1, window_bounds = array<i64: 1, 128, 128>}, {transform_indices = @transform_2, window_bounds = array<i64: 1, 1, 128>}, {transform_indices = @transform_3, window_bounds = array<i64: 1, 16, 128>}]} {
    %c0 = arith.constant 0 : index
    %c0_0 = arith.constant 0 : index
    %c0_1 = arith.constant 0 : index
    %0 = vector.load %arg3[%c0, %c0_0, %c0_1] : memref<1x16x128xbf16, #tpu.memory_space<vmem>>, vector<1x16x128xbf16>
    %1 = vector.shape_cast %0 : vector<1x16x128xbf16> to vector<16x128xbf16>
    %c0_2 = arith.constant 0 : index
    %c0_3 = arith.constant 0 : index
    %c0_4 = arith.constant 0 : index
    %2 = vector.load %arg4[%c0_2, %c0_3, %c0_4] : memref<1x128x128xbf16, #tpu.memory_space<vmem>>, vector<1x128x128xbf16>
    %3 = vector.shape_cast %2 : vector<1x128x128xbf16> to vector<128x128xbf16>
    %cst = arith.constant dense<0.000000e+00> : vector<16x128xf32>
    %4 = tpu.matmul %1, %3, %cst {dimension_numbers = #tpu.dot_dimension_numbers<[1], [0], [0], [1], [0, 0, 1, 1], [], []>} : vector<16x128xbf16>, vector<128x128xbf16>, vector<16x128xf32> -> vector<16x128xf32>
    %c0_5 = arith.constant 0 : index
    %c0_6 = arith.constant 0 : index
    %c0_7 = arith.constant 0 : index
    %5 = vector.load %arg5[%c0_5, %c0_6, %c0_7] : memref<1x1x128xf32, #tpu.memory_space<vmem>>, vector<1x1x128xf32>
    %6 = vector.shape_cast %5 : vector<1x1x128xf32> to vector<1x128xf32>
    %7 = vector.broadcast %6 : vector<1x128xf32> to vector<16x128xf32>
    %8 = arith.addf %4, %7 : vector<16x128xf32>
    %c0_8 = arith.constant 0 : index
    %c0_9 = arith.constant 0 : index
    %c0_10 = arith.constant 0 : index
    %9 = vector.load %arg6[%c0_8, %c0_9, %c0_10] : memref<1x16x128xf32, #tpu.memory_space<vmem>>, vector<1x16x128xf32>
    %10 = vector.shape_cast %9 : vector<1x16x128xf32> to vector<16x128xf32>
    %11 = vector.shape_cast %8 : vector<16x128xf32> to vector<1x16x128xf32>
    tpu.vector_store %arg6[%c0_8, %c0_9, %c0_10], %11 {strides = array<i32>} : memref<1x16x128xf32, #tpu.memory_space<vmem>>, vector<1x16x128xf32>,
    return
  }
  func.func @transform_0(%arg0: i32, %arg1: i32, %arg2: i32) -> (i32, i32, i32) {
    %c0_i32 = arith.constant 0 : i32
    %c0_i32_0 = arith.constant 0 : i32
    return %arg0, %arg1, %c0_i32 : i32, i32, i32
  }
  func.func @transform_1(%arg0: i32, %arg1: i32, %arg2: i32) -> (i32, i32, i32) {
    %c0_i32 = arith.constant 0 : i32
    %c0_i32_0 = arith.constant 0 : i32
    return %arg0, %c0_i32, %arg2 : i32, i32, i32
  }
  func.func @transform_2(%arg0: i32, %arg1: i32, %arg2: i32) -> (i32, i32, i32) {
    %c0_i32 = arith.constant 0 : i32
    %c0_i32_0 = arith.constant 0 : i32
    return %arg0, %c0_i32, %arg2 : i32, i32, i32
  }
  func.func @transform_3(%arg0: i32, %arg1: i32, %arg2: i32) -> (i32, i32, i32) {
    %c0_i32 = arith.constant 0 : i32
    return %arg0, %arg1, %arg2 : i32, i32, i32
  }
}

</mosaic_0001>

<bundles_post_ra>
// kernel: forward.1
= control target key start
LH: loop header
LB: loop body
LE: loop exit
PB: predicated region body
PF: predicated region fallthrough
CT: control target
= control target key end

     0   :  { %8 = vsyncpa [#allocation3], 0  ;;  %s930_s0 = inlined_call_operand.vmem [shape: bf16[2,16,128], index: 0, kind: input, shape index: {}]   ;;  %s931_s1 = inlined_call_operand.hbm [shape: bf16[2,128,128], index: 1, kind: input, shape index: {}]   ;;  %s932_s2 = inlined_call_operand.vmem [shape: f32[2,1,128], index: 2, kind: input, shape index: {}]   ;;  %s933_s3 = inlined_call_operand.vmem [shape: f32[2,16,128], index: 3, kind: output, shape index: {}]  }
   0x1   :  { %10 = vsyncpa [#allocation3 + $0x1], 0  ;;  %s785_s12 = smov 0   ;;  %s787_s13 = smov 0  }
   0x2   :  { %s789_s14 = smov 0   ;;  %s791_s15 = smov 0  }
   0x3   :  { %s793_s16 = smov 0   ;;  %s795_s17 = smov 0  }
   0x4 LB: > { %s553_s18 = sadd.s32 4294967295, %s758_s17   ;;  %s35_s19 = sadd.s32 1, %s754_s16  ;;  %s758_s17 = sphi %s795_s17, %s16_s17   ;;  %s754_s16 = sphi %s793_s16, %s941_s16   ;;  %s750_s15 = sphi %s791_s15, %s940_s15   ;;  %s746_s14 = sphi %s789_s14, %s939_s14   ;;  %s742_s13 = sphi %s787_s13, %s938_s13   ;;  %s738_s12 = sphi %s785_s12, %s937_s12  }
   0x5   : > { %p37_p0 = scmp.ge.s32.totalorder %s35_s19, 2  ;;  %s72_s20 = sadd.s32 1, %s746_s14 }
   0x6   : > { %p79_p1 = scmp.ne.s32.totalorder %s746_s14, %s742_s13  ;;  %p80_p2 = scmp.eq.s32.totalorder %s758_s17, 0 }
   0x7   : > { %s943_s19 = smov (%p37_p0, %s35_s19), 0  ;;  %p85_p4 = scmp.ne.s32.totalorder %s742_s13, %s738_s12 }
   0x8   : > { %p821_p3 = por %p80_p2, %p79_p1  ;;  %s67_s22 = ssub.s32 %s754_s16, %s943_s19 }
   0x9   : > { %p86_p5 = scmp.eq.s32.totalorder %s553_s18, 0  ;;  %p70_p6 = scmp.eq.s32.totalorder %s67_s22, 0 }
   0xa   : > { %p616_p8 = scmp.lt.s32.totalorder %s758_s17, 2  ;;  %s180_s25 = sand.u32 1, %s746_s14  }
   0xb   : > { %p828_p7 = por %p86_p5, %p85_p4  ;;  %s578_s26 = sshll.u32 %s754_s16, 10 }
   0xc   : > { %s834_s24 = scalar_select %p70_p6, %s746_s14, %s72_s20  }
   0xd   : > { %s557_s27 = sshll.u32 %s180_s25, 6  ;;  %s841_s30 = scalar_lea.hbm %s931_s1, %s578_s26 }
   0xe   : > { %s184_s4 = scalar_lea.vmem [#allocation2], %s557_s27  ;;  %p845_p9 = pnand %p616_p8, %p821_p3 }
   0xf   : > { %s192_s5 = sshll.u32 %s184_s4, 4  ;;  %s851_s7 = scalar_lea.sflag [#allocation3], %s180_s25  ;;  %s849_s5 = int_to_ptr.vmem [resolvable:$true] %s192_s5 }
  0x10   : > { %s678_s8 = scalar_lea.hbm %s841_s30, 1024  ;;  %p680_p11 = pneg %p845_p9 }
  0x11   : > { %p679_p10 = scmp.ne.s32.totalorder %s841_s30, %s678_s8  ;;  %s683_s11 = scalar_lea.hbm %s931_s1, 2048 }
  0x12   : > { %p684_p0 = scmp.lt.u32.totalorder %s841_s30, %s931_s1  ;;  %p685_p1 = scmp.lt.u32.totalorder %s683_s11, %s678_s8 }
  0x13   : > { %p681_p12 = pnand %p680_p11, %p679_p10  ;;  %p687_p3 = scmp.lt.u32.totalorder %s678_s8, %s841_s30 }
  0x14   : > { %p686_p2 = por %p685_p1, %p684_p0 }
  0x15   : > { %p682_p13 = pneg %p681_p12 }
  0x16   : > { %p688_p4 = por %p687_p3, %p686_p2 }
  0x18   : > { %p689_p5 = pnand %p688_p4, %p682_p13 }
  0x1a   : > { %692 = shalt.err (!%p689_p5)
}
  0x1b   : > { %s693_s20 = scalar_lea.vmem %s849_s5, 1024  ;;  %s760_s21 = smov [#allocation2]  }
  0x1c   : > { %p694_p6 = scmp.ne.s32.totalorder %s849_s5, %s693_s20  ;;  %s698_s22 = sshll.u32 %s760_s21, 4  ;;  %s699_s22 = int_to_ptr.vmem [resolvable:$false] %s698_s22 }
  0x1d   : > { %s700_s25 = scalar_lea.vmem %s699_s22, 2048  ;;  %p701_p12 = scmp.lt.s32.totalorder %s849_s5, %s699_s22 }
  0x1e   : > { %p696_p8 = pnand %p694_p6, %p680_p11  ;;  %p702_p0 = scmp.lt.s32.totalorder %s700_s25, %s693_s20 }
  0x20   : > { %p697_p10 = pneg %p696_p8  ;;  %p703_p1 = por %p702_p0, %p701_p12 }
  0x22   : > { %p704_p2 = pnand %p703_p1, %p697_p10 }
  0x24   : > { %707 = shalt.err (!%p704_p2)
}
  0x25   : > { %s761_s26 = smov 64   ;;  %s762_s27 = smov 4  }
  0x26   : > { %615 = dma.hbm_to_vmem [thread:$0]  (!%p845_p9), %s841_s30, 1024, %s849_s5, %s851_s7, %s761_s26, %s761_s26, %s762_s27  }
  0x27   : > { %p560_p11 = scmp.ge.s32.totalorder %s758_s17, 1  ;;  %p209_p13 = scmp.lt.s32.totalorder %s758_s17, 3 }
  0x29   : > { %p210_p3 = pnand %p560_p11, %p209_p13 }
  0x2a   : > { %s215_s28 = sand.u32 (!%p210_p3), 1, %s742_s13  }
  0x2b   : > { %213 = sbr.rel (%p210_p3) target bundleno = 301 (0x12d), region = 32  ;;  %s561_s29 = sshll.u32 (!%p210_p3), %s215_s28, 6 }
  0x2c   : > { %s216_s4 = scalar_lea.sflag (!%p210_p3), [#allocation3], %s215_s28  ;;  %s882_s8 = scalar_lea.vmem (!%p210_p3), [#allocation2], %s561_s29 }
  0x32   : > { %733 = dma.done.wait (%p828_p7), %s216_s4, 1024  }
  0x33   : > { %735 = vsyncadd (%p828_p7), %s216_s4, 4294966272  ;;  %v763_v0 = vmov 0.0   ;;  %vm764_vm0 = vmmov 0   ;;  %p265_p9 = scmp.lt.s32.totalorder %s750_s15, 1  ;;  %v669_v1 = vld [vmem:[%s882_s8] sm:$0xff]   ;;  %v670_v2 = vld [vmem:[%s882_s8 + $0x8] sm:$0xff]  }
  0x34   : > { %590 = vmatprep.subr.bf16.mxu0 %v763_v0  ;;  %606 = vmatprep.mubr.msk.bf16.mxu0 %vm764_vm0, %v763_v0  ;;  %v671_v3 = vld [vmem:[%s882_s8 + $0x10] sm:$0xff]   ;;  %v672_v4 = vld [vmem:[%s882_s8 + $0x18] sm:$0xff]   ;;  %v673_v5 = vld [vmem:[%s882_s8 + $0x20] sm:$0xff]  }
  0x35   : > { %s945_s15 = smov (!%p265_p9, %s750_s15), 1  ;;  %591 = vmatpush3.bf16.msra.mxu0 %v669_v1  ;;  %v674_v6 = vld [vmem:[%s882_s8 + $0x28] sm:$0xff]   ;;  %v675_v7 = vld [vmem:[%s882_s8 + $0x30] sm:$0xff]   ;;  %v676_v8 = vld [vmem:[%s882_s8 + $0x38] sm:$0xff]  }
  0x36   : > { %592 = vmatprep.subr.bf16.mxu0 %v763_v0  ;;  %s579_s23 = sshll.u32 %s945_s15, 3  ;;  %s279_s10 = scalar_lea.vmem %s932_s2, %s945_s15 }
  0x37   : > { %s272_s6 = scalar_lea.vmem %s930_s0, %s579_s23  ;;  %s580_s11 = sshll.u32 %s945_s15, 4  ;;  %v566_v10 = vld [vmem:[%s279_s10] ss:$0 sm:$0xff] }
  0x38   : > { %v677_v9 = vld [vmem:[%s272_s6] sm:$0xff]   ;;  %s291_s20 = scalar_lea.vmem %s933_s3, %s580_s11 }
  0x39   : > { %593 = vmatpush3.bf16.msra.mxu0 %v670_v2 }
  0x3a   : > { %594 = vmatprep.subr.bf16.mxu0 %v763_v0 }
  0x3d   : > { %595 = vmatpush3.bf16.msra.mxu0 %v671_v3 }
  0x3e   : > { %596 = vmatprep.subr.bf16.mxu0 %v763_v0 }
  0x41   : > { %597 = vmatpush3.bf16.msra.mxu0 %v672_v4 }
  0x42   : > { %598 = vmatprep.subr.bf16.mxu0 %v763_v0 }
  0x45   : > { %599 = vmatpush3.bf16.msra.mxu0 %v673_v5 }
  0x46   : > { %600 = vmatprep.subr.bf16.mxu0 %v763_v0 }
  0x49   : > { %601 = vmatpush3.bf16.msra.mxu0 %v674_v6 }
  0x4a   : > { %602 = vmatprep.subr.bf16.mxu0 %v763_v0 }
  0x4d   : > { %603 = vmatpush3.bf16.msra.mxu0 %v675_v7 }
  0x4e   : > { %604 = vmatprep.subr.bf16.mxu0 %v763_v0 }
  0x51   : > { %605 = vmatpush3.bf16.msra.mxu0 %v676_v8 }
  0x54   : > { %607 = vmatmul.mubr.bf16.vlgmr.msra.gmra.mrb[0].mxu0 %v677_v9 }
 0x127   : > { %v407_v11 = vpop.f32.mrb[0].mxu0 }
 0x128   : > { %v408_v12 = vadd.f32 %v566_v10, %v407_v11  ;;  %v608_v13 = vpop.f32.mrb[1].mxu0 }
 0x129   : > { %v410_v14 = vpop.f32.mrb[2].mxu0 }
 0x12a   : > { %414 = vst [vmem:[%s291_s20] sm:$0xff] %v408_v12  ;;  %v411_v15 = vadd.f32 %v566_v10, %v410_v14  ;;  %v609_v16 = vpop.f32.mrb[3].mxu0 }
 0x12c   : > { %415 = vst [vmem:[%s291_s20 + $0x8] sm:$0xff] %v411_v15 }
 0x12d PF: > { %s16_s17 = sadd.s32 1, %s758_s17   ;;  %s937_s12 = smov %s742_s13 }
 0x12e   : > { %p13_p7 = scmp.ge.s32.totalorder %s16_s17, 4   ;;  %s938_s13 = smov %s746_s14 }
 0x12f   : > { %s939_s14 = smov %s834_s24  ;;  %s940_s15 = smov %s754_s16 }
 0x130   : > { %s941_s16 = smov %s943_s19  ;;  %15 = sbr.rel (!%p13_p7) target bundleno = 4 (0x4), region = 78 }
 0x137   :  { %452 = vsyncpa [#allocation3], 1 }
 0x138   :  { %454 = vsyncpa [#allocation3 + $0x1], 1 }

</bundles_post_ra>
